<compile_context>
chip_gen: v7x
topology: tpu7x:2x2x1
jax: 0.10.0
libtpu: 0.0.40
codegen_flags: <defaults>
</compile_context>

<pallas_src>
import functools

import jax
import jax.numpy as jnp
import numpy as np
from jax.experimental import pallas as pl
from jax.experimental.pallas import tpu as pltpu


def _round_up(v, m):
    return ((v + m - 1) // m) * m


# ------------------------------------------------------------------ kernel ---
def _conv_fused_kernel(b0_ref, b1_ref, w_ref, cb_ref, eb_ref, o_ref, *,
                       kh, kw, img_w, tm):
    # b0_ref, b1_ref : (1, Cin, tm)      two ADJACENT flattened-spatial tiles of x
    #                                    (tile t and tile t+1 -> gives the shift halo)
    # w_ref          : (KH*KW, Cout, Cin) conv weight, one (Cout, Cin) slab per tap
    # cb_ref, eb_ref : (Cout, 1)          conv bias / fused extra per-channel bias
    # o_ref          : (1, Cout, tm)      lane-dense output tile (lanes = spatial)
    b0 = b0_ref[0]                                   # (Cin, tm)
    b1 = b1_ref[0]                                   # (Cin, tm)
    xcat = jnp.concatenate([b0, b1], axis=-1)        # (Cin, 2*tm), aligned concat

    acc = None
    for i in range(kh):
        for j in range(kw):
            s = i * img_w + j                        # static shift of this tap
            piece = b0 if s == 0 else xcat[:, s:s + tm]          # (Cin, tm)
            wk = w_ref[i * kw + j]                   # (Cout, Cin), static index
            c = jnp.dot(wk, piece, preferred_element_type=jnp.float32)
            acc = c if acc is None else acc + c      # (Cout, tm) f32 accumulator

    acc = acc + cb_ref[...]                          # conv's own bias
    acc = jnp.maximum(acc, 0.0)                      # ReLU
    acc = acc + eb_ref[...]                          # fused extra per-channel bias
    o_ref[0] = acc.astype(o_ref.dtype)


def _fused_conv(x2, w3, cb, eb, *, kh, kw, img_w, tm, n, cout, cin, t):
    kern = functools.partial(_conv_fused_kernel, kh=kh, kw=kw, img_w=img_w, tm=tm)
    kd = kh * kw * cin
    flops = 2 * n * t * tm * cout * kd
    bytes_accessed = 4 * (2 * x2.size + w3.size + cb.size + eb.size
                          + n * cout * t * tm)
    return pl.pallas_call(
        kern,
        out_shape=jax.ShapeDtypeStruct((n, cout, t * tm), jnp.float32),
        grid=(n, t),
        in_specs=[
            pl.BlockSpec((1, cin, tm), lambda b, i: (b, 0, i)),        # tile t
            pl.BlockSpec((1, cin, tm), lambda b, i: (b, 0, i + 1)),    # tile t+1 (halo)
            pl.BlockSpec((kh * kw, cout, cin), lambda b, i: (0, 0, 0)),
            pl.BlockSpec((cout, 1), lambda b, i: (0, 0)),
            pl.BlockSpec((cout, 1), lambda b, i: (0, 0)),
        ],
        out_specs=pl.BlockSpec((1, cout, tm), lambda b, i: (b, 0, i)),
        compiler_params=pltpu.CompilerParams(
            dimension_semantics=("parallel", "parallel")),
        cost_estimate=pl.CostEstimate(
            flops=flops, transcendentals=0, bytes_accessed=bytes_accessed),
    )(x2, x2, w3, cb, eb)


# ------------------------------------------------------------------- glue ----
@functools.partial(jax.jit, static_argnames=("kernel_size",))
def model_forward(x, conv_w, conv_b, extra_bias, *, kernel_size):
    """Equivalent of Model.forward: relu(conv2d(x) + conv_b) + extra_bias."""
    N, Cin, H, W = x.shape
    Cout = conv_w.shape[0]
    kh = kw = kernel_size
    Ho, Wo = H - kh + 1, W - kw + 1
    HW = H * W

    tm = min(1024, _round_up(HW, 128))          # lane-dense tile along spatial
    max_shift = (kh - 1) * W + (kw - 1)
    assert max_shift <= tm, "image row too wide for this tile size"

    T = -(-HW // tm)                            # spatial tiles per image
    hw_in_pad = (T + 1) * tm                    # +1 tile so block t+1 always exists

    # Only input-sized data movement in the wrapper (no 9x im2col, no big pad).
    x2 = jnp.pad(x.reshape(N, Cin, HW), ((0, 0), (0, 0), (0, hw_in_pad - HW)))
    # tap k = i*kw + j  ->  (Cout, Cin) weight slab
    w3 = conv_w.transpose(2, 3, 0, 1).reshape(kh * kw, Cout, Cin)
    cb = conv_b.reshape(Cout, 1)
    eb = extra_bias.reshape(Cout, 1)

    out = _fused_conv(x2, w3, cb, eb, kh=kh, kw=kw, img_w=W, tm=tm,
                      n=N, cout=Cout, cin=Cin, t=T)      # (N, Cout, T*tm)
    # Reshapes straight to NCHW: no transpose pass over HBM.
    out = out[:, :, :HW].reshape(N, Cout, H, W)[:, :, :Ho, :Wo]
    return out


# -------------------------------------------------------------- reference ----
def reference_forward(x, conv_w, conv_b, extra_bias):
    y = jax.lax.conv_general_dilated(
        x, conv_w, window_strides=(1, 1), padding="VALID",
        dimension_numbers=("NCHW", "OIHW", "NCHW"))
    y = y + conv_b.reshape(1, -1, 1, 1)
    y = jnp.maximum(y, 0.0)
    y = y + extra_bias.reshape(1, -1, 1, 1)
    return y


# ------------------------------------------------------------------- main ----
if __name__ == "__main__":
    key = jax.random.PRNGKey(0)
    k_x, k_w, k_b, k_eb = jax.random.split(key, 4)

    N, Cin, H, W = 2, 4, 16, 16
    Cout, K = 8, 3

    x = jax.random.normal(k_x, (N, Cin, H, W), dtype=jnp.float32)
    conv_w = jax.random.normal(k_w, (Cout, Cin, K, K), dtype=jnp.float32) * 0.1
    conv_b = jax.random.normal(k_b, (Cout,), dtype=jnp.float32) * 0.1
    extra_bias = jax.random.normal(k_eb, (Cout, 1, 1), dtype=jnp.float32)

    out = model_forward(x, conv_w, conv_b, extra_bias, kernel_size=K)
    out = jax.block_until_ready(out)

    ref = reference_forward(x, conv_w, conv_b, extra_bias)
    np.testing.assert_allclose(np.asarray(out), np.asarray(ref),
                               rtol=1e-4, atol=1e-4)
    print("KERNEL_OK")
</pallas_src>

<mosaic_0001>
module attributes {stable_mosaic.version = 11 : i64} {
  func.func @_conv_fused_kernel(%arg0: i32, %arg1: i32, %arg2: memref<1x4x256xf32, #tpu.memory_space<vmem>>, %arg3: memref<1x4x256xf32, #tpu.memory_space<vmem>>, %arg4: memref<9x8x4xf32, #tpu.memory_space<vmem>>, %arg5: memref<8x1xf32, #tpu.memory_space<vmem>>, %arg6: memref<8x1xf32, #tpu.memory_space<vmem>>, %arg7: memref<1x8x256xf32, #tpu.memory_space<vmem>>) attributes {dimension_semantics = [#tpu.dimension_semantics<parallel>, #tpu.dimension_semantics<parallel>], iteration_bounds = array<i64: 2, 1>, scalar_prefetch = 0 : i64, scratch_operands = 0 : i64, tpu.core_type = #tpu.core_type<tc>, window_params = [{transform_indices = @transform_0, window_bounds = array<i64: 1, 4, 256>}, {transform_indices = @transform_1, window_bounds = array<i64: 1, 4, 256>}, {pipeline_mode = #tpu.pipeline_mode<synchronous>, transform_indices = @transform_2, window_bounds = array<i64: 9, 8, 4>}, {pipeline_mode = #tpu.pipeline_mode<synchronous>, transform_indices = @transform_3, window_bounds = array<i64: 8, 1>}, {pipeline_mode = #tpu.pipeline_mode<synchronous>, transform_indices = @transform_4, window_bounds = array<i64: 8, 1>}, {transform_indices = @transform_5, window_bounds = array<i64: 1, 8, 256>}]} {
    %c0 = arith.constant 0 : index
    %c0_0 = arith.constant 0 : index
    %c0_1 = arith.constant 0 : index
    %0 = vector.load %arg2[%c0, %c0_0, %c0_1] : memref<1x4x256xf32, #tpu.memory_space<vmem>>, vector<1x4x256xf32>
    %1 = vector.shape_cast %0 : vector<1x4x256xf32> to vector<4x256xf32>
    %c0_2 = arith.constant 0 : index
    %c0_3 = arith.constant 0 : index
    %c0_4 = arith.constant 0 : index
    %2 = vector.load %arg3[%c0_2, %c0_3, %c0_4] : memref<1x4x256xf32, #tpu.memory_space<vmem>>, vector<1x4x256xf32>
    %3 = vector.shape_cast %2 : vector<1x4x256xf32> to vector<4x256xf32>
    %4 = tpu.concatenate %1, %3 in 1 : vector<4x256xf32>, vector<4x256xf32> -> vector<4x512xf32>
    %c0_5 = arith.constant 0 : index
    %c0_6 = arith.constant 0 : index
    %c0_7 = arith.constant 0 : index
    %5 = vector.load %arg4[%c0_5, %c0_6, %c0_7] : memref<9x8x4xf32, #tpu.memory_space<vmem>>, vector<1x8x4xf32>
    %6 = vector.shape_cast %5 : vector<1x8x4xf32> to vector<8x4xf32>
    %cst = arith.constant dense<0.000000e+00> : vector<8x256xf32>
    %7 = tpu.matmul %6, %1, %cst {dimension_numbers = #tpu.dot_dimension_numbers<[1], [0], [0], [1], [0, 0, 1, 1], [], []>} : vector<8x4xf32>, vector<4x256xf32>, vector<8x256xf32> -> vector<8x256xf32>
    %8 = vector.extract_strided_slice %4 {offsets = [0, 1], sizes = [4, 256], strides = [1, 1]} : vector<4x512xf32> to vector<4x256xf32>
    %c1 = arith.constant 1 : index
    %c0_8 = arith.constant 0 : index
    %c0_9 = arith.constant 0 : index
    %9 = vector.load %arg4[%c1, %c0_8, %c0_9] : memref<9x8x4xf32, #tpu.memory_space<vmem>>, vector<1x8x4xf32>
    %10 = vector.shape_cast %9 : vector<1x8x4xf32> to vector<8x4xf32>
    %cst_10 = arith.constant dense<0.000000e+00> : vector<8x256xf32>
    %11 = tpu.matmul %10, %8, %cst_10 {dimension_numbers = #tpu.dot_dimension_numbers<[1], [0], [0], [1], [0, 0, 1, 1], [], []>} : vector<8x4xf32>, vector<4x256xf32>, vector<8x256xf32> -> vector<8x256xf32>
    %12 = arith.addf %7, %11 : vector<8x256xf32>
    %13 = vector.extract_strided_slice %4 {offsets = [0, 2], sizes = [4, 256], strides = [1, 1]} : vector<4x512xf32> to vector<4x256xf32>
    %c2 = arith.constant 2 : index
    %c0_11 = arith.constant 0 : index
    %c0_12 = arith.constant 0 : index
    %14 = vector.load %arg4[%c2, %c0_11, %c0_12] : memref<9x8x4xf32, #tpu.memory_space<vmem>>, vector<1x8x4xf32>
    %15 = vector.shape_cast %14 : vector<1x8x4xf32> to vector<8x4xf32>
    %cst_13 = arith.constant dense<0.000000e+00> : vector<8x256xf32>
    %16 = tpu.matmul %15, %13, %cst_13 {dimension_numbers = #tpu.dot_dimension_numbers<[1], [0], [0], [1], [0, 0, 1, 1], [], []>} : vector<8x4xf32>, vector<4x256xf32>, vector<8x256xf32> -> vector<8x256xf32>
    %17 = arith.addf %12, %16 : vector<8x256xf32>
    %18 = vector.extract_strided_slice %4 {offsets = [0, 16], sizes = [4, 256], strides = [1, 1]} : vector<4x512xf32> to vector<4x256xf32>
    %c3 = arith.constant 3 : index
    %c0_14 = arith.constant 0 : index
    %c0_15 = arith.constant 0 : index
    %19 = vector.load %arg4[%c3, %c0_14, %c0_15] : memref<9x8x4xf32, #tpu.memory_space<vmem>>, vector<1x8x4xf32>
    %20 = vector.shape_cast %19 : vector<1x8x4xf32> to vector<8x4xf32>
    %cst_16 = arith.constant dense<0.000000e+00> : vector<8x256xf32>
    %21 = tpu.matmul %20, %18, %cst_16 {dimension_numbers = #tpu.dot_dimension_numbers<[1], [0], [0], [1], [0, 0, 1, 1], [], []>} : vector<8x4xf32>, vector<4x256xf32>, vector<8x256xf32> -> vector<8x256xf32>
    %22 = arith.addf %17, %21 : vector<8x256xf32>
    %23 = vector.extract_strided_slice %4 {offsets = [0, 17], sizes = [4, 256], strides = [1, 1]} : vector<4x512xf32> to vector<4x256xf32>
    %c4 = arith.constant 4 : index
    %c0_17 = arith.constant 0 : index
    %c0_18 = arith.constant 0 : index
    %24 = vector.load %arg4[%c4, %c0_17, %c0_18] : memref<9x8x4xf32, #tpu.memory_space<vmem>>, vector<1x8x4xf32>
    %25 = vector.shape_cast %24 : vector<1x8x4xf32> to vector<8x4xf32>
    %cst_19 = arith.constant dense<0.000000e+00> : vector<8x256xf32>
    %26 = tpu.matmul %25, %23, %cst_19 {dimension_numbers = #tpu.dot_dimension_numbers<[1], [0], [0], [1], [0, 0, 1, 1], [], []>} : vector<8x4xf32>, vector<4x256xf32>, vector<8x256xf32> -> vector<8x256xf32>
    %27 = arith.addf %22, %26 : vector<8x256xf32>
    %28 = vector.extract_strided_slice %4 {offsets = [0, 18], sizes = [4, 256], strides = [1, 1]} : vector<4x512xf32> to vector<4x256xf32>
    %c5 = arith.constant 5 : index
    %c0_20 = arith.constant 0 : index
    %c0_21 = arith.constant 0 : index
    %29 = vector.load %arg4[%c5, %c0_20, %c0_21] : memref<9x8x4xf32, #tpu.memory_space<vmem>>, vector<1x8x4xf32>
    %30 = vector.shape_cast %29 : vector<1x8x4xf32> to vector<8x4xf32>
    %cst_22 = arith.constant dense<0.000000e+00> : vector<8x256xf32>
    %31 = tpu.matmul %30, %28, %cst_22 {dimension_numbers = #tpu.dot_dimension_numbers<[1], [0], [0], [1], [0, 0, 1, 1], [], []>} : vector<8x4xf32>, vector<4x256xf32>, vector<8x256xf32> -> vector<8x256xf32>
    %32 = arith.addf %27, %31 : vector<8x256xf32>
    %33 = vector.extract_strided_slice %4 {offsets = [0, 32], sizes = [4, 256], strides = [1, 1]} : vector<4x512xf32> to vector<4x256xf32>
    %c6 = arith.constant 6 : index
    %c0_23 = arith.constant 0 : index
    %c0_24 = arith.constant 0 : index
    %34 = vector.load %arg4[%c6, %c0_23, %c0_24] : memref<9x8x4xf32, #tpu.memory_space<vmem>>, vector<1x8x4xf32>
    %35 = vector.shape_cast %34 : vector<1x8x4xf32> to vector<8x4xf32>
    %cst_25 = arith.constant dense<0.000000e+00> : vector<8x256xf32>
    %36 = tpu.matmul %35, %33, %cst_25 {dimension_numbers = #tpu.dot_dimension_numbers<[1], [0], [0], [1], [0, 0, 1, 1], [], []>} : vector<8x4xf32>, vector<4x256xf32>, vector<8x256xf32> -> vector<8x256xf32>
    %37 = arith.addf %32, %36 : vector<8x256xf32>
    %38 = vector.extract_strided_slice %4 {offsets = [0, 33], sizes = [4, 256], strides = [1, 1]} : vector<4x512xf32> to vector<4x256xf32>
    %c7 = arith.constant 7 : index
    %c0_26 = arith.constant 0 : index
    %c0_27 = arith.constant 0 : index
    %39 = vector.load %arg4[%c7, %c0_26, %c0_27] : memref<9x8x4xf32, #tpu.memory_space<vmem>>, vector<1x8x4xf32>
    %40 = vector.shape_cast %39 : vector<1x8x4xf32> to vector<8x4xf32>
    %cst_28 = arith.constant dense<0.000000e+00> : vector<8x256xf32>
    %41 = tpu.matmul %40, %38, %cst_28 {dimension_numbers = #tpu.dot_dimension_numbers<[1], [0], [0], [1], [0, 0, 1, 1], [], []>} : vector<8x4xf32>, vector<4x256xf32>, vector<8x256xf32> -> vector<8x256xf32>
    %42 = arith.addf %37, %41 : vector<8x256xf32>
    %43 = vector.extract_strided_slice %4 {offsets = [0, 34], sizes = [4, 256], strides = [1, 1]} : vector<4x512xf32> to vector<4x256xf32>
    %c8 = arith.constant 8 : index
    %c0_29 = arith.constant 0 : index
    %c0_30 = arith.constant 0 : index
    %44 = vector.load %arg4[%c8, %c0_29, %c0_30] : memref<9x8x4xf32, #tpu.memory_space<vmem>>, vector<1x8x4xf32>
    %45 = vector.shape_cast %44 : vector<1x8x4xf32> to vector<8x4xf32>
    %cst_31 = arith.constant dense<0.000000e+00> : vector<8x256xf32>
    %46 = tpu.matmul %45, %43, %cst_31 {dimension_numbers = #tpu.dot_dimension_numbers<[1], [0], [0], [1], [0, 0, 1, 1], [], []>} : vector<8x4xf32>, vector<4x256xf32>, vector<8x256xf32> -> vector<8x256xf32>
    %47 = arith.addf %42, %46 : vector<8x256xf32>
    %c0_32 = arith.constant 0 : index
    %c0_33 = arith.constant 0 : index
    %48 = vector.load %arg5[%c0_32, %c0_33] : memref<8x1xf32, #tpu.memory_space<vmem>>, vector<8x1xf32>
    %49 = vector.broadcast %48 : vector<8x1xf32> to vector<8x256xf32>
    %50 = arith.addf %47, %49 : vector<8x256xf32>
    %cst_34 = arith.constant 0.000000e+00 : f32
    %51 = vector.broadcast %cst_34 : f32 to vector<8x256xf32>
    %52 = arith.maximumf %50, %51 : vector<8x256xf32>
    %c0_35 = arith.constant 0 : index
    %c0_36 = arith.constant 0 : index
    %53 = vector.load %arg6[%c0_35, %c0_36] : memref<8x1xf32, #tpu.memory_space<vmem>>, vector<8x1xf32>
    %54 = vector.broadcast %53 : vector<8x1xf32> to vector<8x256xf32>
    %55 = arith.addf %52, %54 : vector<8x256xf32>
    %c0_37 = arith.constant 0 : index
    %c0_38 = arith.constant 0 : index
    %c0_39 = arith.constant 0 : index
    %56 = vector.load %arg7[%c0_37, %c0_38, %c0_39] : memref<1x8x256xf32, #tpu.memory_space<vmem>>, vector<1x8x256xf32>
    %57 = vector.shape_cast %56 : vector<1x8x256xf32> to vector<8x256xf32>
    %58 = vector.shape_cast %55 : vector<8x256xf32> to vector<1x8x256xf32>
    tpu.vector_store %arg7[%c0_37, %c0_38, %c0_39], %58 {strides = array<i32>} : memref<1x8x256xf32, #tpu.memory_space<vmem>>, vector<1x8x256xf32>,
    return
  }
  func.func @transform_0(%arg0: i32, %arg1: i32) -> (i32, i32, i32) {
    %c0_i32 = arith.constant 0 : i32
    %c0_i32_0 = arith.constant 0 : i32
    return %arg0, %c0_i32, %arg1 : i32, i32, i32
  }
  func.func @transform_1(%arg0: i32, %arg1: i32) -> (i32, i32, i32) {
    %c1_i32 = arith.constant 1 : i32
    %0 = arith.addi %arg1, %c1_i32 : i32
    %c0_i32 = arith.constant 0 : i32
    %c0_i32_0 = arith.constant 0 : i32
    return %arg0, %c0_i32, %0 : i32, i32, i32
  }
  func.func @transform_2(%arg0: i32, %arg1: i32) -> (i32, i32, i32) {
    %c0_i32 = arith.constant 0 : i32
    %c0_i32_0 = arith.constant 0 : i32
    %c0_i32_1 = arith.constant 0 : i32
    %c0_i32_2 = arith.constant 0 : i32
    return %c0_i32, %c0_i32_0, %c0_i32_1 : i32, i32, i32
  }
  func.func @transform_3(%arg0: i32, %arg1: i32) -> (i32, i32) {
    %c0_i32 = arith.constant 0 : i32
    %c0_i32_0 = arith.constant 0 : i32
    %c0_i32_1 = arith.constant 0 : i32
    return %c0_i32, %c0_i32_0 : i32, i32
  }
  func.func @transform_4(%arg0: i32, %arg1: i32) -> (i32, i32) {
    %c0_i32 = arith.constant 0 : i32
    %c0_i32_0 = arith.constant 0 : i32
    %c0_i32_1 = arith.constant 0 : i32
    return %c0_i32, %c0_i32_0 : i32, i32
  }
  func.func @transform_5(%arg0: i32, %arg1: i32) -> (i32, i32, i32) {
    %c0_i32 = arith.constant 0 : i32
    %c0_i32_0 = arith.constant 0 : i32
    return %arg0, %c0_i32, %arg1 : i32, i32, i32
  }
}

</mosaic_0001>

<bundles_post_ra>
// kernel: model_forward.1
= control target key start
LH: loop header
LB: loop body
LE: loop exit
PB: predicated region body
PF: predicated region fallthrough
CT: control target
= control target key end

     0   :  { %s1414_s18 = smov 0   ;;  %s1416_s19 = smov 0   ;;  %s1556_s0 = inlined_call_operand.vmem [shape: f32[2,4,512], index: 0, kind: input, shape index: {}, may-alias: {0,1}]   ;;  %s1557_s1 = inlined_call_operand.vmem [shape: f32[2,4,512], index: 1, kind: input, shape index: {}, may-alias: {0,1}]   ;;  %s1558_s2 = inlined_call_operand.vmem [shape: f32[9,8,4], index: 2, kind: input, shape index: {}]   ;;  %s1559_s3 = inlined_call_operand.vmem [shape: f32[8,1], index: 3, kind: input, shape index: {}]   ;;  %s1560_s4 = inlined_call_operand.vmem [shape: f32[8,1], index: 4, kind: input, shape index: {}]   ;;  %s1561_s5 = inlined_call_operand.vmem [shape: f32[2,8,256], index: 5, kind: output, shape index: {}]  }
   0x1   :  { %s1418_s20 = smov 0  }
   0x2 LB: > { %s27_s21 = sadd.s32 1, %s1368_s19  ;;  %p1248_p0 = scmp.ge.s32.totalorder %s1372_s20, 1  ;;  %s1372_s20 = sphi %s1418_s20, %s15_s20   ;;  %s1368_s19 = sphi %s1416_s19, %s1563_s19   ;;  %s1364_s18 = sphi %s1414_s18, %s1562_s18  }
   0x3   : > { %p29_p1 = scmp.ge.s32.totalorder %s27_s21, 2  ;;  %p229_p2 = scmp.lt.s32.totalorder %s1372_s20, 3 }
   0x5   : > { %s1565_s21 = smov (%p29_p1, %s27_s21), 0  ;;  %p230_p3 = pnand %p1248_p0, %p229_p2 }
   0x6   : > { %p276_p4 = scmp.lt.s32.totalorder (!%p230_p3), %s1364_s18, 1  ;;  %s1374_s30 = smov (!%p230_p3), 111   ;;  %v1375_v3 = vmov (!%p230_p3), 0.0   ;;  %v1381_v4 = vmov (!%p230_p3), 0   ;;  %v1129_v5 = vld [vmem:[%s1560_s4] sm:$0xff] (!%p230_p3)  ;;  %vm321_vm0 = vcmask (!%p230_p3), 1039360  }
   0x7   : > { %233 = sbr.rel (%p230_p3) target bundleno = 402 (0x192), region = 40  ;;  %746 = vmatprep.mubr.f32.mxu0 (!%p230_p3), %v1375_v3  ;;  %397 = vmatprep.mubr.f32.mxu1 (!%p230_p3), %v1375_v3  ;;  %s1376_s6 = smov (!%p230_p3), 127   ;;  %v1119_v6 = vld [vmem:[%s1559_s3] sm:$0xff] (!%p230_p3)  ;;  %vm328_vm1 = vcmask (!%p230_p3), 1043456   ;;  %vm672_vm2 = vcmask (!%p230_p3), 908288   ;;  %vm324_vm3 = vcmask (!%p230_p3), 31744  }
   0x8   : > { %s1377_s7 = smov (!%p230_p3), 110   ;;  %s1378_s8 = smov (!%p230_p3), 96   ;;  %1347 = vset.pattern.permute.xlu0 (!%p230_p3), %v1381_v4  ;;  %1348 = vset.pattern.permute.xlu1 (!%p230_p3), %v1381_v4  ;;  %v1270_v16 = vld [vmem:[%s1558_s2 + $0x20] sm:$0xff] (!%p230_p3)  ;;  %vm763_vm4 = vcmask (!%p230_p3), 900096   ;;  %v1255_v18 = vld [vmem:[%s1558_s2 + $0x8] sm:$0xff] (!%p230_p3)  ;;  %vm854_vm5 = vcmask (!%p230_p3), 785408  }
   0x9   : > { %s1379_s9 = smov (!%p230_p3), 126   ;;  %s1380_s10 = smov (!%p230_p3), 95   ;;  %v1274_v25 = vld [vmem:[%s1558_s2 + $0x28] sm:$0xff] (!%p230_p3)  ;;  %v312_v27 = vld [vmem:[%s1558_s2] sm:$0xff] (!%p230_p3)  ;;  %vm490_vm6 = vcmask (!%p230_p3), 1031168   ;;  %v1278_v34 = vld [vmem:[%s1558_s2 + $0x30] sm:$0xff] (!%p230_p3) }
   0xa   : > { %s1382_s11 = smov (!%p230_p3), 112   ;;  %s1383_s12 = smov (!%p230_p3), 94   ;;  %vm945_vm7 = vcmask (!%p230_p3), 777216   ;;  %v1262_v41 = vld [vmem:[%s1558_s2 + $0x10] sm:$0xff] (!%p230_p3)  ;;  %v1282_v43 = vld [vmem:[%s1558_s2 + $0x38] sm:$0xff] (!%p230_p3)  ;;  %vm581_vm8 = vcmask (!%p230_p3), 916480  }
   0xb   : > { %vm1036_vm9 = vcmask (!%p230_p3), 769024   ;;  %v1286_v51 = vld [vmem:[%s1558_s2 + $0x40] sm:$0xff] (!%p230_p3)  ;;  %v1266_v54 = vld [vmem:[%s1558_s2 + $0x18] sm:$0xff] (!%p230_p3) }
   0xe   : > { %s1567_s18 = smov (!%p276_p4, %s1364_s18), 1 }
   0xf   : > { %s1432_s22 = sshll.u32 %s1567_s18, 4 }
  0x10   : > { %s283_s25 = scalar_lea.vmem %s1556_s0, %s1432_s22  ;;  %s1294_s26 = sadd.s32 8, %s1432_s22 }
  0x11   : > { %v1439_v0 = vld [vmem:[%s283_s25] sm:$0xff]  ;;  %s294_s29 = scalar_lea.vmem %s1557_s1, %s1294_s26  ;;  %s305_s16 = scalar_lea.vmem %s1561_s5, %s1432_s22 }
  0x12   : > { %666 = vrot.lane.b32.xlu1 %v1439_v0, %s1374_s30  ;;  %v308_v1 = vld [vmem:[%s294_s29] sm:$0xff]  ;;  %v1447_v2 = vcombine.high %v1439_v0, %v1439_v0 }
  0x13   : > { %670 = vrot.lane.b32.xlu0 %v308_v1, %s1374_s30 }
  0x16   : > { %317 = vrot.lane.b32.xlu1 %v1447_v2, %s1376_s6 }
  0x17   : > { %319 = vrot.lane.b32.xlu0 %v308_v1, %s1376_s6 }
  0x1a   : > { %759 = vrot.lane.b32.xlu1 %v1447_v2, %s1377_s7 }
  0x1b   : > { %668 = vrot.lane.b32.xlu0 %v1447_v2, %s1374_s30 }
  0x1e   : > { %315 = vrot.lane.b32.xlu1 %v1439_v0, %s1376_s6 }
  0x1f   : > { %761 = vrot.lane.b32.xlu0 %v308_v1, %s1377_s7 }
  0x22   : > { %850 = vrot.lane.b32.xlu1 %v1447_v2, %s1378_s8 }
  0x23   : > { %757 = vrot.lane.b32.xlu0 %v1439_v0, %s1377_s7 }
  0x26   : > { %848 = vrot.lane.b32.xlu1 %v1439_v0, %s1378_s8 }
  0x27   : > { %852 = vrot.lane.b32.xlu0 %v308_v1, %s1378_s8 }
  0x2a   : > { %488 = vrot.lane.b32.xlu1 %v308_v1, %s1379_s9 }
  0x2b   : > { %486 = vrot.lane.b32.xlu0 %v1447_v2, %s1379_s9 }
  0x2e   : > { %943 = vrot.lane.b32.xlu1 %v308_v1, %s1380_s10 }
  0x2f   : > { %941 = vrot.lane.b32.xlu0 %v1447_v2, %s1380_s10 }
  0x32   : > { %939 = vrot.lane.b32.xlu1 %v1439_v0, %s1380_s10 }
  0x33   : > { %484 = vrot.lane.b32.xlu0 %v1439_v0, %s1379_s9 }
  0x36   : > { %579 = vrot.lane.b32.xlu1 %v308_v1, %s1382_s11 }
  0x37   : > { %577 = vrot.lane.b32.xlu0 %v1447_v2, %s1382_s11 }
  0x3a   : > { %1034 = vrot.lane.b32.xlu1 %v308_v1, %s1383_s12 }
  0x3b   : > { %1032 = vrot.lane.b32.xlu0 %v1447_v2, %s1383_s12 }
  0x3e   : > { %1030 = vrot.lane.b32.xlu1 %v1439_v0, %s1383_s12 }
  0x3f   : > { %575 = vrot.lane.b32.xlu0 %v1439_v0, %s1382_s11 }
  0x42   : > { %1132 = vperm.xlu1 %1348, %v1129_v5  }
  0x43   : > { %1122 = vperm.xlu0 %1347, %v1119_v6  }
  0x84   : > { %v667_v7 = vpop.permute.xlu1 %666 }
  0x85   : > { %v671_v8 = vpop.permute.xlu0 %670 }
  0x88   : > { %v318_v9 = vpop.permute.xlu1 %317 }
  0x89   : > { %v320_v10 = vpop.permute.xlu0 %319 }
  0x8a   : > { %v323_v11 = vsel %vm321_vm0, %v318_v9, %v320_v10 }
  0x8b   : > { %1256 = vmatprep.subr.msk.mxu1 %vm328_vm1, %v323_v11 }
  0x8c   : > { %v760_v12 = vpop.permute.xlu1 %759 }
  0x8d   : > { %v669_v13 = vpop.permute.xlu0 %668 }
  0x8e   : > { %v674_v14 = vsel %vm672_vm2, %v669_v13, %v671_v8  ;;  %v673_v15 = vsel %vm672_vm2, %v667_v7, %v669_v13 }
  0x8f   : > { %1271 = vmatprep.subr.msk.mxu0 %vm328_vm1, %v674_v14 }
  0x90   : > { %v316_v17 = vpop.permute.xlu1 %315  ;;  %1272 = vmatpush1.msk.msra.mxu0 %vm328_vm1, %v673_v15 }
  0x91   : > { %v762_v19 = vpop.permute.xlu0 %761  ;;  %v322_v20 = vsel %vm321_vm0, %v316_v17, %v318_v9  ;;  %1273 = vmatmul.mubr.msk.f32.vlgmr.msra.gmra.mrb[0].mxu0 %vm324_vm3, %v1270_v16 }
  0x92   : > { %v765_v21 = vsel %vm763_vm4, %v760_v12, %v762_v19  ;;  %1257 = vmatpush1.msk.msra.mxu1 %vm328_vm1, %v322_v20  ;;  %837 = vmatprep.mubr.f32.mxu0 %v1375_v3 }
  0x93   : > { %1275 = vmatprep.subr.msk.mxu0 %vm328_vm1, %v765_v21  ;;  %1258 = vmatmul.mubr.msk.f32.vlgmr.msra.gmra.mrb[0].mxu1 %vm324_vm3, %v1255_v18 }
  0x94   : > { %v851_v22 = vpop.permute.xlu1 %850  ;;  %1259 = vmatprep.subr.msk.mxu1 %vm328_vm1, %v1447_v2  ;;  %475 = vmatprep.mubr.f32.mxu1 %v1375_v3 }
  0x95   : > { %v758_v23 = vpop.permute.xlu0 %757  ;;  %1260 = vmatpush1.msk.msra.mxu1 %vm328_vm1, %v1439_v0 }
  0x96   : > { %v764_v24 = vsel %vm763_vm4, %v758_v23, %v760_v12 }
  0x97   : > { %1276 = vmatpush1.msk.msra.mxu0 %vm328_vm1, %v764_v24 }
  0x98   : > { %v849_v26 = vpop.permute.xlu1 %848 }
  0x99   : > { %v853_v28 = vpop.permute.xlu0 %852  ;;  %1277 = vmatmul.mubr.msk.f32.vlgmr.msra.gmra.mrb[0].mxu0 %vm324_vm3, %v1274_v25  ;;  %v855_v30 = vsel %vm854_vm5, %v849_v26, %v851_v22 }
  0x9a   : > { %v856_v29 = vsel %vm854_vm5, %v851_v22, %v853_v28  ;;  %928 = vmatprep.mubr.f32.mxu0 %v1375_v3 }
  0x9b   : > { %1279 = vmatprep.subr.msk.mxu0 %vm328_vm1, %v856_v29  ;;  %1261 = vmatmul.mubr.msk.f32.vlgmr.msra.gmra.mrb[0].mxu1 %vm324_vm3, %v312_v27 }
  0x9c   : > { %v489_v31 = vpop.permute.xlu1 %488  ;;  %1280 = vmatpush1.msk.msra.mxu0 %vm328_vm1, %v855_v30  ;;  %564 = vmatprep.mubr.f32.mxu1 %v1375_v3 }
  0x9d   : > { %v487_v32 = vpop.permute.xlu0 %486 }
  0x9e   : > { %v492_v33 = vsel %vm490_vm6, %v487_v32, %v489_v31 }
  0x9f   : > { %1263 = vmatprep.subr.msk.mxu1 %vm328_vm1, %v492_v33 }
  0xa0   : > { %v944_v35 = vpop.permute.xlu1 %943 }
  0xa1   : > { %v942_v36 = vpop.permute.xlu0 %941  ;;  %1281 = vmatmul.mubr.msk.f32.vlgmr.msra.gmra.mrb[0].mxu0 %vm324_vm3, %v1278_v34 }
  0xa2   : > { %v947_v37 = vsel %vm945_vm7, %v942_v36, %v944_v35  ;;  %1019 = vmatprep.mubr.f32.mxu0 %v1375_v3 }
  0xa3   : > { %1283 = vmatprep.subr.msk.mxu0 %vm328_vm1, %v947_v37 }
  0xa4   : > { %v940_v38 = vpop.permute.xlu1 %939 }
  0xa5   : > { %v946_v39 = vsel %vm945_vm7, %v940_v38, %v942_v36  ;;  %v485_v40 = vpop.permute.xlu0 %484 }
  0xa6   : > { %v491_v42 = vsel %vm490_vm6, %v485_v40, %v487_v32  ;;  %1284 = vmatpush1.msk.msra.mxu0 %vm328_vm1, %v946_v39 }
  0xa7   : > { %1264 = vmatpush1.msk.msra.mxu1 %vm328_vm1, %v491_v42 }
  0xa8   : > { %v580_v44 = vpop.permute.xlu1 %579  ;;  %1265 = vmatmul.mubr.msk.f32.vlgmr.msra.gmra.mrb[0].mxu1 %vm324_vm3, %v1262_v41 }
  0xa9   : > { %v578_v45 = vpop.permute.xlu0 %577  ;;  %1285 = vmatmul.mubr.msk.f32.vlgmr.msra.gmra.mrb[0].mxu0 %vm324_vm3, %v1282_v43  ;;  %655 = vmatprep.mubr.f32.mxu1 %v1375_v3 }
  0xaa   : > { %v583_v46 = vsel %vm581_vm8, %v578_v45, %v580_v44  ;;  %1110 = vmatprep.mubr.f32.mxu0 %v1375_v3 }
  0xab   : > { %1267 = vmatprep.subr.msk.mxu1 %vm328_vm1, %v583_v46 }
  0xac   : > { %v1035_v47 = vpop.permute.xlu1 %1034 }
  0xad   : > { %v1033_v48 = vpop.permute.xlu0 %1032 }
  0xae   : > { %v1038_v49 = vsel %vm1036_vm9, %v1033_v48, %v1035_v47 }
  0xaf   : > { %1287 = vmatprep.subr.msk.mxu0 %vm328_vm1, %v1038_v49 }
  0xb0   : > { %v1031_v50 = vpop.permute.xlu1 %1030 }
  0xb1   : > { %v1037_v52 = vsel %vm1036_vm9, %v1031_v50, %v1033_v48  ;;  %v576_v53 = vpop.permute.xlu0 %575 }
  0xb2   : > { %v582_v55 = vsel %vm581_vm8, %v576_v53, %v578_v45  ;;  %1288 = vmatpush1.msk.msra.mxu0 %vm328_vm1, %v1037_v52 }
  0xb3   : > { %1268 = vmatpush1.msk.msra.mxu1 %vm328_vm1, %v582_v55  ;;  %1289 = vmatmul.mubr.msk.f32.vlgmr.msra.gmra.mrb[0].mxu0 %vm324_vm3, %v1286_v51 }
  0xb4   : > { %1269 = vmatmul.mubr.msk.f32.vlgmr.msra.gmra.mrb[0].mxu1 %vm324_vm3, %v1266_v54 }
  0xc1   : > { %v1133_v1 = vpop.permute.xlu1 %1132 }
  0xc2   : > { %v1123_v57 = vpop.permute.xlu0 %1122 }
 0x186   : > { %v1112_v56 = vpop.f32.mrb[0].mxu0 }
 0x187   : > { %v657_v58 = vpop.f32.mrb[0].mxu1  ;;  %v1114_v59 = vpop.f32.mrb[1].mxu0 }
 0x188   : > { %v1297_v60 = vadd.f32 %v1112_v56, %v657_v58  ;;  %v659_v61 = vpop.f32.mrb[1].mxu1 }
 0x189   : > { %v1298_v62 = vadd.f32 %v1114_v59, %v659_v61 }
 0x18a   : > { %v1125_v63 = vadd.f32 %v1297_v60, %v1123_v57 }
 0x18b   : > { %v1126_v0 = vadd.f32 %v1298_v62, %v1123_v57 }
 0x18c   : > { %v1127_v2 = vmax.f32 %v1125_v63, 0.0 }
 0x18d   : > { %v1128_v3 = vmax.f32 %v1126_v0, 0.0 }
 0x18e   : > { %v1135_v4 = vadd.f32 %v1133_v1, %v1127_v2 }
 0x18f   : > { %v1136_v5 = vadd.f32 %v1133_v1, %v1128_v3 }
 0x190   : > { %1137 = vst [vmem:[%s305_s16] sm:$0xff] %v1135_v4 }
 0x191   : > { %1138 = vst [vmem:[%s305_s16 + $0x8] sm:$0xff] %v1136_v5 }
 0x192 PF: > { %s15_s20 = sadd.s32 1, %s1372_s20   ;;  %s1562_s18 = smov %s1368_s19 }
 0x193   : > { %p12_p5 = scmp.ge.s32.totalorder %s15_s20, 4   ;;  %s1563_s19 = smov %s1565_s21 }
 0x195   :  { %14 = sbr.rel (!%p12_p5) target bundleno = 2 (0x2), region = 81 }

</bundles_post_ra>
